<compile_context>
chip_gen: v6e
topology: v6e:2x2x1
jax: 0.10.0
libtpu: 0.0.40
codegen_flags: <defaults>
</compile_context>

<pallas_src>
import jax
import jax.numpy as jnp
import numpy as np
from jax.experimental import pallas as pl
from jax.experimental.pallas import tpu as pltpu

BN_EPS = 1e-5


# ----------------------------------------------------------------------------
# Kernel
# ----------------------------------------------------------------------------
def basic_block_kernel(x_ref, w1_ref, w2_ref, wsc_ref, b1_ref, b2_ref,
                       out_ref, xpad_s, mid_s):
    # x_ref:   (B, H, W*Cin)        bf16, width-packed activations (this block)
    # w1_ref:  (3, W*Cin, W*Cmid)   bf16, banded conv1 weights (BN1 scale folded)
    # w2_ref:  (3, W*Cmid, W*Cmid)  bf16, banded conv2 weights (BN2 scale folded)
    # wsc_ref: (W*Cin, W*Cmid)      bf16, block-diag 1x1 shortcut (BNsc folded)
    # b1_ref:  (1, W*Cmid)          f32, BN1 bias (tiled over W)
    # b2_ref:  (1, W*Cmid)          f32, BN2 bias + shortcut-BN bias (tiled)
    # out_ref: (B, H, W*Cmid)       f32 output
    # xpad_s:  (B, H+2, W*Cin)      bf16 VMEM staging (H-padded input)
    # mid_s:   (B, H+2, W*Cmid)     bf16 VMEM staging (H-padded conv1 output)
    B, H, WCin = x_ref.shape
    WCmid = out_ref.shape[2]
    M = B * H

    x = x_ref[...]                                       # load once, reuse

    # ---- stage the input with zero rows top/bottom (H padding; W padding is
    #      already folded into the banded weights).  Only the 2 border rows
    #      are zeroed — no full scratch zero-fill.
    zin = jnp.zeros((B, 1, WCin), xpad_s.dtype)
    xpad_s[:, 0:1, :] = zin
    xpad_s[:, H + 1:H + 2, :] = zin
    xpad_s[:, 1:H + 1, :] = x

    # ---- conv1 (+ BN1 scale folded): 3 lane-dense MXU matmuls, f32 accumulate
    acc1 = jnp.dot(xpad_s[:, 0:H, :].reshape(M, WCin), w1_ref[0],
                   preferred_element_type=jnp.float32)
    for kh in (1, 2):
        acc1 += jnp.dot(xpad_s[:, kh:kh + H, :].reshape(M, WCin), w1_ref[kh],
                        preferred_element_type=jnp.float32)
    out1 = jnp.maximum(acc1 + b1_ref[...], 0.0)          # BN1 bias + ReLU (f32)

    # ---- stage conv1 output (bf16) for conv2, H-padded
    zmid = jnp.zeros((B, 1, WCmid), mid_s.dtype)
    mid_s[:, 0:1, :] = zmid
    mid_s[:, H + 1:H + 2, :] = zmid
    mid_s[:, 1:H + 1, :] = out1.reshape(B, H, WCmid).astype(mid_s.dtype)

    # ---- conv2 (+ BN2 scale folded), accumulated into the shortcut result
    acc2 = jnp.dot(x.reshape(M, WCin), wsc_ref[...],     # 1x1 shortcut proj
                   preferred_element_type=jnp.float32)
    for kh in (0, 1, 2):
        acc2 += jnp.dot(mid_s[:, kh:kh + H, :].reshape(M, WCmid), w2_ref[kh],
                        preferred_element_type=jnp.float32)

    # ---- residual add is already inside acc2; add merged biases + ReLU
    out = jnp.maximum(acc2 + b2_ref[...], 0.0)
    out_ref[...] = out.reshape(B, H, WCmid).astype(out_ref.dtype)


# ----------------------------------------------------------------------------
# Host-side weight / bias packing
# ----------------------------------------------------------------------------
def fold_bn(gamma, beta, mean, var, eps=BN_EPS):
    scale = gamma / jnp.sqrt(var + eps)
    bias = beta - mean * scale
    return scale.astype(jnp.float32), bias.astype(jnp.float32)


def _band_select(W):
    # S[kw, wi, wo] = 1 iff input column wi == wo + kw - 1 is in range (pad=1).
    S = np.zeros((3, W, W), np.float32)
    for kw in range(3):
        for wo in range(W):
            wi = wo + kw - 1
            if 0 <= wi < W:
                S[kw, wi, wo] = 1.0
    return jnp.asarray(S)


def pack_conv3x3(w_hwio, W):
    """(3,3,Cin,Cout) -> (3, W*Cin, W*Cout) banded matrices (one per kh tap).

    The kw taps and the width zero-padding are folded into the band structure,
    so a 3x3 conv becomes 3 lane-dense matmuls over the width-packed layout."""
    _, _, Cin, Cout = w_hwio.shape
    S = _band_select(W)
    wb = jnp.einsum("kyio,yab->kaibo", w_hwio.astype(jnp.float32), S)
    return wb.reshape(3, W * Cin, W * Cout)


def pack_conv1x1(w_io, W):
    """(Cin,Cout) -> (W*Cin, W*Cout) block-diagonal matrix."""
    return jnp.kron(jnp.eye(W, dtype=jnp.float32), w_io.astype(jnp.float32))


def _pick_batch_block(N, H):
    # Aim for ~128 matmul rows per grid step while dividing N evenly.
    target = max(1, 128 // H)
    for b in range(min(N, target), 0, -1):
        if N % b == 0:
            return b
    return 1


# ----------------------------------------------------------------------------
# Wrapper
# ----------------------------------------------------------------------------
def basic_block_pallas(x_nchw, params):
    """Fused BasicBlock forward. Input/output are NCHW (PyTorch convention).
    (NCHW<->NHWC transposes are boundary glue; an NHWC-native caller can skip
    them and feed the packed (N,H,W*C) layout directly.)"""
    x = jnp.transpose(x_nchw, (0, 2, 3, 1)).astype(jnp.float32)   # -> NHWC
    N, H, W, Cin = x.shape
    Cmid = params["w1"].shape[-1]

    s1, b1 = fold_bn(params["bn1_gamma"], params["bn1_beta"],
                     params["bn1_mean"], params["bn1_var"])
    s2, b2 = fold_bn(params["bn2_gamma"], params["bn2_beta"],
                     params["bn2_mean"], params["bn2_var"])
    ssc, bsc = fold_bn(params["bnsc_gamma"], params["bnsc_beta"],
                       params["bnsc_mean"], params["bnsc_var"])

    # Fold BN scale into conv weights (over Cout); build banded/packed weights.
    w1s = params["w1"] * s1
    w2s = params["w2"] * s2
    wscs = params["wsc"] * ssc
    wb1 = pack_conv3x3(w1s, W).astype(jnp.bfloat16)     # (3, W*Cin, W*Cmid)
    wb2 = pack_conv3x3(w2s, W).astype(jnp.bfloat16)     # (3, W*Cmid, W*Cmid)
    wbsc = pack_conv1x1(wscs, W).astype(jnp.bfloat16)   # (W*Cin, W*Cmid)

    # Width-tiled biases; merge conv2-BN and shortcut-BN biases.
    b1p = jnp.tile(b1, W).reshape(1, W * Cmid).astype(jnp.float32)
    b2p = jnp.tile(b2 + bsc, W).reshape(1, W * Cmid).astype(jnp.float32)

    # Width-packed bf16 activations: channels ride the lane axis.
    xp = x.reshape(N, H, W * Cin).astype(jnp.bfloat16)

    B_BLK = _pick_batch_block(N, H)
    grid = (N // B_BLK,)

    out = pl.pallas_call(
        basic_block_kernel,
        out_shape=jax.ShapeDtypeStruct((N, H, W * Cmid), jnp.float32),
        grid_spec=pltpu.PrefetchScalarGridSpec(
            num_scalar_prefetch=0,
            grid=grid,
            in_specs=[
                pl.BlockSpec((B_BLK, H, W * Cin), lambda n: (n, 0, 0)),
                pl.BlockSpec((3, W * Cin, W * Cmid), lambda n: (0, 0, 0)),
                pl.BlockSpec((3, W * Cmid, W * Cmid), lambda n: (0, 0, 0)),
                pl.BlockSpec((W * Cin, W * Cmid), lambda n: (0, 0)),
                pl.BlockSpec((1, W * Cmid), lambda n: (0, 0)),
                pl.BlockSpec((1, W * Cmid), lambda n: (0, 0)),
            ],
            out_specs=pl.BlockSpec((B_BLK, H, W * Cmid), lambda n: (n, 0, 0)),
            scratch_shapes=[
                pltpu.VMEM((B_BLK, H + 2, W * Cin), jnp.bfloat16),
                pltpu.VMEM((B_BLK, H + 2, W * Cmid), jnp.bfloat16),
            ],
        ),
        compiler_params=pltpu.CompilerParams(
            dimension_semantics=("parallel",)),   # batch-block axis is independent
    )(xp, wb1, wb2, wbsc, b1p, b2p)

    out = out.reshape(N, H, W, Cmid)
    return jnp.transpose(out, (0, 3, 1, 2))                       # -> NCHW


basic_block_pallas_jit = jax.jit(basic_block_pallas)


# ----------------------------------------------------------------------------
# Pure-JAX reference (eval-mode BN, same bf16-input / f32-accumulate policy)
# ----------------------------------------------------------------------------
def basic_block_reference(x_nchw, params):
    x = jnp.transpose(x_nchw, (0, 2, 3, 1)).astype(jnp.float32)
    Cin = x.shape[-1]
    Cmid = params["w1"].shape[-1]

    s1, b1 = fold_bn(params["bn1_gamma"], params["bn1_beta"],
                     params["bn1_mean"], params["bn1_var"])
    s2, b2 = fold_bn(params["bn2_gamma"], params["bn2_beta"],
                     params["bn2_mean"], params["bn2_var"])
    ssc, bsc = fold_bn(params["bnsc_gamma"], params["bnsc_beta"],
                       params["bnsc_mean"], params["bnsc_var"])

    w1s = (params["w1"] * s1).astype(jnp.bfloat16)
    w2s = (params["w2"] * s2).astype(jnp.bfloat16)
    wscs = (params["wsc"] * ssc).astype(jnp.bfloat16).reshape(1, 1, Cin, Cmid)
    xb = x.astype(jnp.bfloat16)

    def conv(inp, w):
        return jax.lax.conv_general_dilated(
            inp, w, window_strides=(1, 1), padding="SAME",
            dimension_numbers=("NHWC", "HWIO", "NHWC"),
            preferred_element_type=jnp.float32)

    out1 = jax.nn.relu(conv(xb, w1s) + b1)
    out2 = conv(out1.astype(jnp.bfloat16), w2s) + b2
    sc = conv(xb, wscs) + bsc
    out = jax.nn.relu(out2 + sc)
    return jnp.transpose(out, (0, 3, 1, 2))


# ----------------------------------------------------------------------------
# Params / demo
# ----------------------------------------------------------------------------
def make_params(key, in_planes, planes):
    ks = jax.random.split(key, 12)
    if in_planes == planes:
        # identity shortcut (stride=1, in_planes==planes): wsc=I, BN=identity
        wsc = jnp.eye(in_planes, dtype=jnp.float32)
    else:
        wsc = jax.random.normal(ks[2], (in_planes, planes), jnp.float32) * 0.2
    return {
        # conv weights, HWIO
        "w1": jax.random.normal(ks[0], (3, 3, in_planes, planes), jnp.float32) * 0.2,
        "w2": jax.random.normal(ks[1], (3, 3, planes, planes), jnp.float32) * 0.2,
        "wsc": wsc,
        # BatchNorm affine + running stats (eval mode)
        "bn1_gamma": jax.random.uniform(ks[3], (planes,), minval=0.5, maxval=1.5),
        "bn1_beta": jax.random.normal(ks[4], (planes,)) * 0.1,
        "bn1_mean": jax.random.normal(ks[5], (planes,)) * 0.1,
        "bn1_var": jax.random.uniform(ks[6], (planes,), minval=0.5, maxval=1.5),
        "bn2_gamma": jax.random.uniform(ks[7], (planes,), minval=0.5, maxval=1.5),
        "bn2_beta": jax.random.normal(ks[8], (planes,)) * 0.1,
        "bn2_mean": jax.random.normal(ks[9], (planes,)) * 0.1,
        "bn2_var": jax.random.uniform(ks[10], (planes,), minval=0.5, maxval=1.5),
        "bnsc_gamma": jnp.ones((planes,), jnp.float32),
        "bnsc_beta": jnp.zeros((planes,), jnp.float32),
        "bnsc_mean": jnp.zeros((planes,), jnp.float32),
        "bnsc_var": jnp.ones((planes,), jnp.float32),
    }


if __name__ == "__main__":
    key = jax.random.PRNGKey(0)
    k_x, k_p = jax.random.split(key)

    # stride=1, in_planes != planes -> projection shortcut path
    N, in_planes, planes, H, W = 2, 4, 8, 16, 16
    x = jax.random.normal(k_x, (N, in_planes, H, W), jnp.float32)   # NCHW like PyTorch
    params = make_params(k_p, in_planes, planes)

    out = jax.block_until_ready(basic_block_pallas_jit(x, params))
    ref = jax.block_until_ready(basic_block_reference(x, params))

    np.testing.assert_allclose(np.asarray(out), np.asarray(ref), rtol=2e-2, atol=2e-2)
    assert out.shape == (N, planes, H, W)

    print("KERNEL_OK")
</pallas_src>

<mosaic_0001>
module attributes {stable_mosaic.version = 11 : i64} {
  func.func @basic_block_kernel(%arg0: i32, %arg1: memref<2x16x64xbf16, #tpu.memory_space<vmem>>, %arg2: memref<3x64x128xbf16, #tpu.memory_space<vmem>>, %arg3: memref<3x128x128xbf16, #tpu.memory_space<vmem>>, %arg4: memref<64x128xbf16, #tpu.memory_space<vmem>>, %arg5: memref<1x128xf32, #tpu.memory_space<vmem>>, %arg6: memref<1x128xf32, #tpu.memory_space<vmem>>, %arg7: memref<2x16x128xf32, #tpu.memory_space<vmem>>, %arg8: memref<2x18x64xbf16, #tpu.memory_space<vmem>>, %arg9: memref<2x18x128xbf16, #tpu.memory_space<vmem>>) attributes {dimension_semantics = [#tpu.dimension_semantics<parallel>], iteration_bounds = array<i64: 1>, scalar_prefetch = 0 : i64, scratch_operands = 2 : i64, tpu.core_type = #tpu.core_type<tc>, window_params = [{transform_indices = @transform_0, window_bounds = array<i64: 2, 16, 64>}, {pipeline_mode = #tpu.pipeline_mode<synchronous>, transform_indices = @transform_1, window_bounds = array<i64: 3, 64, 128>}, {pipeline_mode = #tpu.pipeline_mode<synchronous>, transform_indices = @transform_2, window_bounds = array<i64: 3, 128, 128>}, {pipeline_mode = #tpu.pipeline_mode<synchronous>, transform_indices = @transform_3, window_bounds = array<i64: 64, 128>}, {pipeline_mode = #tpu.pipeline_mode<synchronous>, transform_indices = @transform_4, window_bounds = array<i64: 1, 128>}, {pipeline_mode = #tpu.pipeline_mode<synchronous>, transform_indices = @transform_5, window_bounds = array<i64: 1, 128>}, {transform_indices = @transform_6, window_bounds = array<i64: 2, 16, 128>}]} {
    %c0 = arith.constant 0 : index
    %c0_0 = arith.constant 0 : index
    %c0_1 = arith.constant 0 : index
    %0 = vector.load %arg1[%c0, %c0_0, %c0_1] : memref<2x16x64xbf16, #tpu.memory_space<vmem>>, vector<2x16x64xbf16>
    %cst = arith.constant 0.000000e+00 : bf16
    %1 = vector.broadcast %cst : bf16 to vector<2x1x64xbf16>
    %c0_2 = arith.constant 0 : index
    %c0_3 = arith.constant 0 : index
    %c0_4 = arith.constant 0 : index
    %2 = vector.load %arg8[%c0_2, %c0_3, %c0_4] : memref<2x18x64xbf16, #tpu.memory_space<vmem>>, vector<2x1x64xbf16>
    tpu.vector_store %arg8[%c0_2, %c0_3, %c0_4], %1 {strides = array<i32>} : memref<2x18x64xbf16, #tpu.memory_space<vmem>>, vector<2x1x64xbf16>,
    %c0_5 = arith.constant 0 : index
    %c17 = arith.constant 17 : index
    %c0_6 = arith.constant 0 : index
    %3 = vector.load %arg8[%c0_5, %c17, %c0_6] : memref<2x18x64xbf16, #tpu.memory_space<vmem>>, vector<2x1x64xbf16>
    tpu.vector_store %arg8[%c0_5, %c17, %c0_6], %1 {strides = array<i32>} : memref<2x18x64xbf16, #tpu.memory_space<vmem>>, vector<2x1x64xbf16>,
    %c0_7 = arith.constant 0 : index
    %c1 = arith.constant 1 : index
    %c0_8 = arith.constant 0 : index
    %4 = vector.load %arg8[%c0_7, %c1, %c0_8] : memref<2x18x64xbf16, #tpu.memory_space<vmem>>, vector<2x16x64xbf16>
    tpu.vector_store %arg8[%c0_7, %c1, %c0_8], %0 {strides = array<i32>} : memref<2x18x64xbf16, #tpu.memory_space<vmem>>, vector<2x16x64xbf16>,
    %c0_9 = arith.constant 0 : index
    %c0_10 = arith.constant 0 : index
    %c0_11 = arith.constant 0 : index
    %5 = vector.load %arg8[%c0_9, %c0_10, %c0_11] : memref<2x18x64xbf16, #tpu.memory_space<vmem>>, vector<2x16x64xbf16>
    %6 = vector.shape_cast %5 : vector<2x16x64xbf16> to vector<32x64xbf16>
    %c0_12 = arith.constant 0 : index
    %c0_13 = arith.constant 0 : index
    %c0_14 = arith.constant 0 : index
    %7 = vector.load %arg2[%c0_12, %c0_13, %c0_14] : memref<3x64x128xbf16, #tpu.memory_space<vmem>>, vector<1x64x128xbf16>
    %8 = vector.shape_cast %7 : vector<1x64x128xbf16> to vector<64x128xbf16>
    %cst_15 = arith.constant dense<0.000000e+00> : vector<32x128xf32>
    %9 = tpu.matmul %6, %8, %cst_15 {dimension_numbers = #tpu.dot_dimension_numbers<[1], [0], [0], [1], [0, 0, 1, 1], [], []>} : vector<32x64xbf16>, vector<64x128xbf16>, vector<32x128xf32> -> vector<32x128xf32>
    %c0_16 = arith.constant 0 : index
    %c1_17 = arith.constant 1 : index
    %c0_18 = arith.constant 0 : index
    %10 = vector.load %arg8[%c0_16, %c1_17, %c0_18] : memref<2x18x64xbf16, #tpu.memory_space<vmem>>, vector<2x16x64xbf16>
    %11 = vector.shape_cast %10 : vector<2x16x64xbf16> to vector<32x64xbf16>
    %c1_19 = arith.constant 1 : index
    %c0_20 = arith.constant 0 : index
    %c0_21 = arith.constant 0 : index
    %12 = vector.load %arg2[%c1_19, %c0_20, %c0_21] : memref<3x64x128xbf16, #tpu.memory_space<vmem>>, vector<1x64x128xbf16>
    %13 = vector.shape_cast %12 : vector<1x64x128xbf16> to vector<64x128xbf16>
    %cst_22 = arith.constant dense<0.000000e+00> : vector<32x128xf32>
    %14 = tpu.matmul %11, %13, %cst_22 {dimension_numbers = #tpu.dot_dimension_numbers<[1], [0], [0], [1], [0, 0, 1, 1], [], []>} : vector<32x64xbf16>, vector<64x128xbf16>, vector<32x128xf32> -> vector<32x128xf32>
    %15 = arith.addf %9, %14 : vector<32x128xf32>
    %c0_23 = arith.constant 0 : index
    %c2 = arith.constant 2 : index
    %c0_24 = arith.constant 0 : index
    %16 = vector.load %arg8[%c0_23, %c2, %c0_24] : memref<2x18x64xbf16, #tpu.memory_space<vmem>>, vector<2x16x64xbf16>
    %17 = vector.shape_cast %16 : vector<2x16x64xbf16> to vector<32x64xbf16>
    %c2_25 = arith.constant 2 : index
    %c0_26 = arith.constant 0 : index
    %c0_27 = arith.constant 0 : index
    %18 = vector.load %arg2[%c2_25, %c0_26, %c0_27] : memref<3x64x128xbf16, #tpu.memory_space<vmem>>, vector<1x64x128xbf16>
    %19 = vector.shape_cast %18 : vector<1x64x128xbf16> to vector<64x128xbf16>
    %cst_28 = arith.constant dense<0.000000e+00> : vector<32x128xf32>
    %20 = tpu.matmul %17, %19, %cst_28 {dimension_numbers = #tpu.dot_dimension_numbers<[1], [0], [0], [1], [0, 0, 1, 1], [], []>} : vector<32x64xbf16>, vector<64x128xbf16>, vector<32x128xf32> -> vector<32x128xf32>
    %21 = arith.addf %15, %20 : vector<32x128xf32>
    %c0_29 = arith.constant 0 : index
    %c0_30 = arith.constant 0 : index
    %22 = vector.load %arg5[%c0_29, %c0_30] : memref<1x128xf32, #tpu.memory_space<vmem>>, vector<1x128xf32>
    %23 = vector.broadcast %22 : vector<1x128xf32> to vector<32x128xf32>
    %24 = arith.addf %21, %23 : vector<32x128xf32>
    %cst_31 = arith.constant 0.000000e+00 : f32
    %25 = vector.broadcast %cst_31 : f32 to vector<32x128xf32>
    %26 = arith.maximumf %24, %25 : vector<32x128xf32>
    %cst_32 = arith.constant 0.000000e+00 : bf16
    %27 = vector.broadcast %cst_32 : bf16 to vector<2x1x128xbf16>
    %c0_33 = arith.constant 0 : index
    %c0_34 = arith.constant 0 : index
    %c0_35 = arith.constant 0 : index
    %28 = vector.load %arg9[%c0_33, %c0_34, %c0_35] : memref<2x18x128xbf16, #tpu.memory_space<vmem>>, vector<2x1x128xbf16>
    tpu.vector_store %arg9[%c0_33, %c0_34, %c0_35], %27 {strides = array<i32>} : memref<2x18x128xbf16, #tpu.memory_space<vmem>>, vector<2x1x128xbf16>,
    %c0_36 = arith.constant 0 : index
    %c17_37 = arith.constant 17 : index
    %c0_38 = arith.constant 0 : index
    %29 = vector.load %arg9[%c0_36, %c17_37, %c0_38] : memref<2x18x128xbf16, #tpu.memory_space<vmem>>, vector<2x1x128xbf16>
    tpu.vector_store %arg9[%c0_36, %c17_37, %c0_38], %27 {strides = array<i32>} : memref<2x18x128xbf16, #tpu.memory_space<vmem>>, vector<2x1x128xbf16>,
    %30 = vector.shape_cast %26 : vector<32x128xf32> to vector<2x16x128xf32>
    %31 = arith.truncf %30 : vector<2x16x128xf32> to vector<2x16x128xbf16>
    %c0_39 = arith.constant 0 : index
    %c1_40 = arith.constant 1 : index
    %c0_41 = arith.constant 0 : index
    %32 = vector.load %arg9[%c0_39, %c1_40, %c0_41] : memref<2x18x128xbf16, #tpu.memory_space<vmem>>, vector<2x16x128xbf16>
    tpu.vector_store %arg9[%c0_39, %c1_40, %c0_41], %31 {strides = array<i32>} : memref<2x18x128xbf16, #tpu.memory_space<vmem>>, vector<2x16x128xbf16>,
    %33 = vector.shape_cast %0 : vector<2x16x64xbf16> to vector<32x64xbf16>
    %c0_42 = arith.constant 0 : index
    %c0_43 = arith.constant 0 : index
    %34 = vector.load %arg4[%c0_42, %c0_43] : memref<64x128xbf16, #tpu.memory_space<vmem>>, vector<64x128xbf16>
    %cst_44 = arith.constant dense<0.000000e+00> : vector<32x128xf32>
    %35 = tpu.matmul %33, %34, %cst_44 {dimension_numbers = #tpu.dot_dimension_numbers<[1], [0], [0], [1], [0, 0, 1, 1], [], []>} : vector<32x64xbf16>, vector<64x128xbf16>, vector<32x128xf32> -> vector<32x128xf32>
    %c0_45 = arith.constant 0 : index
    %c0_46 = arith.constant 0 : index
    %c0_47 = arith.constant 0 : index
    %36 = vector.load %arg9[%c0_45, %c0_46, %c0_47] : memref<2x18x128xbf16, #tpu.memory_space<vmem>>, vector<2x16x128xbf16>
    %37 = vector.shape_cast %36 : vector<2x16x128xbf16> to vector<32x128xbf16>
    %c0_48 = arith.constant 0 : index
    %c0_49 = arith.constant 0 : index
    %c0_50 = arith.constant 0 : index
    %38 = vector.load %arg3[%c0_48, %c0_49, %c0_50] : memref<3x128x128xbf16, #tpu.memory_space<vmem>>, vector<1x128x128xbf16>
    %39 = vector.shape_cast %38 : vector<1x128x128xbf16> to vector<128x128xbf16>
    %cst_51 = arith.constant dense<0.000000e+00> : vector<32x128xf32>
    %40 = tpu.matmul %37, %39, %cst_51 {dimension_numbers = #tpu.dot_dimension_numbers<[1], [0], [0], [1], [0, 0, 1, 1], [], []>} : vector<32x128xbf16>, vector<128x128xbf16>, vector<32x128xf32> -> vector<32x128xf32>
    %41 = arith.addf %35, %40 : vector<32x128xf32>
    %c0_52 = arith.constant 0 : index
    %c1_53 = arith.constant 1 : index
    %c0_54 = arith.constant 0 : index
    %42 = vector.load %arg9[%c0_52, %c1_53, %c0_54] : memref<2x18x128xbf16, #tpu.memory_space<vmem>>, vector<2x16x128xbf16>
    %43 = vector.shape_cast %42 : vector<2x16x128xbf16> to vector<32x128xbf16>
    %c1_55 = arith.constant 1 : index
    %c0_56 = arith.constant 0 : index
    %c0_57 = arith.constant 0 : index
    %44 = vector.load %arg3[%c1_55, %c0_56, %c0_57] : memref<3x128x128xbf16, #tpu.memory_space<vmem>>, vector<1x128x128xbf16>
    %45 = vector.shape_cast %44 : vector<1x128x128xbf16> to vector<128x128xbf16>
    %cst_58 = arith.constant dense<0.000000e+00> : vector<32x128xf32>
    %46 = tpu.matmul %43, %45, %cst_58 {dimension_numbers = #tpu.dot_dimension_numbers<[1], [0], [0], [1], [0, 0, 1, 1], [], []>} : vector<32x128xbf16>, vector<128x128xbf16>, vector<32x128xf32> -> vector<32x128xf32>
    %47 = arith.addf %41, %46 : vector<32x128xf32>
    %c0_59 = arith.constant 0 : index
    %c2_60 = arith.constant 2 : index
    %c0_61 = arith.constant 0 : index
    %48 = vector.load %arg9[%c0_59, %c2_60, %c0_61] : memref<2x18x128xbf16, #tpu.memory_space<vmem>>, vector<2x16x128xbf16>
    %49 = vector.shape_cast %48 : vector<2x16x128xbf16> to vector<32x128xbf16>
    %c2_62 = arith.constant 2 : index
    %c0_63 = arith.constant 0 : index
    %c0_64 = arith.constant 0 : index
    %50 = vector.load %arg3[%c2_62, %c0_63, %c0_64] : memref<3x128x128xbf16, #tpu.memory_space<vmem>>, vector<1x128x128xbf16>
    %51 = vector.shape_cast %50 : vector<1x128x128xbf16> to vector<128x128xbf16>
    %cst_65 = arith.constant dense<0.000000e+00> : vector<32x128xf32>
    %52 = tpu.matmul %49, %51, %cst_65 {dimension_numbers = #tpu.dot_dimension_numbers<[1], [0], [0], [1], [0, 0, 1, 1], [], []>} : vector<32x128xbf16>, vector<128x128xbf16>, vector<32x128xf32> -> vector<32x128xf32>
    %53 = arith.addf %47, %52 : vector<32x128xf32>
    %c0_66 = arith.constant 0 : index
    %c0_67 = arith.constant 0 : index
    %54 = vector.load %arg6[%c0_66, %c0_67] : memref<1x128xf32, #tpu.memory_space<vmem>>, vector<1x128xf32>
    %55 = vector.broadcast %54 : vector<1x128xf32> to vector<32x128xf32>
    %56 = arith.addf %53, %55 : vector<32x128xf32>
    %cst_68 = arith.constant 0.000000e+00 : f32
    %57 = vector.broadcast %cst_68 : f32 to vector<32x128xf32>
    %58 = arith.maximumf %56, %57 : vector<32x128xf32>
    %59 = vector.shape_cast %58 : vector<32x128xf32> to vector<2x16x128xf32>
    %c0_69 = arith.constant 0 : index
    %c0_70 = arith.constant 0 : index
    %c0_71 = arith.constant 0 : index
    %60 = vector.load %arg7[%c0_69, %c0_70, %c0_71] : memref<2x16x128xf32, #tpu.memory_space<vmem>>, vector<2x16x128xf32>
    tpu.vector_store %arg7[%c0_69, %c0_70, %c0_71], %59 {strides = array<i32>} : memref<2x16x128xf32, #tpu.memory_space<vmem>>, vector<2x16x128xf32>,
    return
  }
  func.func @transform_0(%arg0: i32) -> (i32, i32, i32) {
    %c0_i32 = arith.constant 0 : i32
    %c0_i32_0 = arith.constant 0 : i32
    %c0_i32_1 = arith.constant 0 : i32
    return %arg0, %c0_i32, %c0_i32_0 : i32, i32, i32
  }
  func.func @transform_1(%arg0: i32) -> (i32, i32, i32) {
    %c0_i32 = arith.constant 0 : i32
    %c0_i32_0 = arith.constant 0 : i32
    %c0_i32_1 = arith.constant 0 : i32
    %c0_i32_2 = arith.constant 0 : i32
    return %c0_i32, %c0_i32_0, %c0_i32_1 : i32, i32, i32
  }
  func.func @transform_2(%arg0: i32) -> (i32, i32, i32) {
    %c0_i32 = arith.constant 0 : i32
    %c0_i32_0 = arith.constant 0 : i32
    %c0_i32_1 = arith.constant 0 : i32
    %c0_i32_2 = arith.constant 0 : i32
    return %c0_i32, %c0_i32_0, %c0_i32_1 : i32, i32, i32
  }
  func.func @transform_3(%arg0: i32) -> (i32, i32) {
    %c0_i32 = arith.constant 0 : i32
    %c0_i32_0 = arith.constant 0 : i32
    %c0_i32_1 = arith.constant 0 : i32
    return %c0_i32, %c0_i32_0 : i32, i32
  }
  func.func @transform_4(%arg0: i32) -> (i32, i32) {
    %c0_i32 = arith.constant 0 : i32
    %c0_i32_0 = arith.constant 0 : i32
    %c0_i32_1 = arith.constant 0 : i32
    return %c0_i32, %c0_i32_0 : i32, i32
  }
  func.func @transform_5(%arg0: i32) -> (i32, i32) {
    %c0_i32 = arith.constant 0 : i32
    %c0_i32_0 = arith.constant 0 : i32
    %c0_i32_1 = arith.constant 0 : i32
    return %c0_i32, %c0_i32_0 : i32, i32
  }
  func.func @transform_6(%arg0: i32) -> (i32, i32, i32) {
    %c0_i32 = arith.constant 0 : i32
    %c0_i32_0 = arith.constant 0 : i32
    %c0_i32_1 = arith.constant 0 : i32
    return %arg0, %c0_i32, %c0_i32_0 : i32, i32, i32
  }
}

</mosaic_0001>

<bundles_post_ra>
// kernel: tile.18
= control target key start
LH: loop header
LB: loop body
LE: loop exit
PB: predicated region body
PF: predicated region fallthrough
CT: control target
= control target key end

     0   :  { %s28_s0 = inlined_call_operand.vmem [shape: f32[8], index: 0, kind: input, shape index: {}]   ;;  %s29_s1 = inlined_call_operand.vmem [shape: f32[16,8], index: 1, kind: output, shape index: {}]  }
   0x1   :  { %v4_v0 = vld [vmem:[%s28_s0] ss:$0 sm:$0xff] }
   0x2   :  { %5 = vst [vmem:[%s29_s1] sm:$0xff] %v4_v0  ;;  %8 = vst [vmem:[%s29_s1 + $0x8] sm:$0xff] %v4_v0 }

// kernel: tile.19
= control target key start
LH: loop header
LB: loop body
LE: loop exit
PB: predicated region body
PF: predicated region fallthrough
CT: control target
= control target key end

     0   :  { %s133_s10 = smov 120   ;;  %s134_s11 = smov 104   ;;  %vm3_vm0 = vcmask 64512   ;;  %vm9_vm1 = vcmask 1048512   ;;  %vm15_vm2 = vcmask 982912   ;;  %vm21_vm3 = vcmask 917312   ;;  %s209_s0 = inlined_call_operand.vmem [shape: f32[16,8], index: 0, kind: input, shape index: {}]   ;;  %s210_s1 = inlined_call_operand.vmem [shape: f32[1,128], index: 1, kind: output, shape index: {}]  }
   0x1   :  { %v103_v0 = vld [vmem:[%s209_s0 + $0xf] sm:$0x1]   ;;  %v105_v1 = vld [vmem:[%s209_s0 + $0xd] sm:$0x1]   ;;  %v104_v2 = vld [vmem:[%s209_s0 + $0xe] sm:$0x1]  }
   0x2   :  { %7 = vrot.lane.b32.xlu0 %v103_v0, %s133_s10  ;;  %19 = vrot.lane.b32.xlu1 %v105_v1, %s134_s11  ;;  %v106_v3 = vld [vmem:[%s209_s0 + $0xc] sm:$0x1]   ;;  %s135_s16 = smov 112   ;;  %s136_s17 = smov 96   ;;  %v107_v4 = vld [vmem:[%s209_s0 + $0xb] sm:$0x1]  }
   0x3   :  { %v108_v5 = vld [vmem:[%s209_s0 + $0xa] sm:$0x1]   ;;  %v2_v6 = vld [vmem:[%s209_s0] sm:$0x1]   ;;  %s137_s24 = smov 88   ;;  %s138_s25 = smov 80  }
   0x4   :  { %4 = vst.msk [vmem:[#allocation0] sm:$0x1] %vm3_vm0, %v2_v6   ;;  %v109_v7 = vld [vmem:[%s209_s0 + $0x9] sm:$0x1]   ;;  %v110_v8 = vld [vmem:[%s209_s0 + $0x8] sm:$0x1]  }
   0x5   :  { %s139_s30 = smov 72   ;;  %s140_s2 = smov 64   ;;  %v111_v9 = vld [vmem:[%s209_s0 + $0x7] sm:$0x1]   ;;  %v112_v10 = vld [vmem:[%s209_s0 + $0x6] sm:$0x1]  }
   0x6   :  { %13 = vrot.lane.b32.xlu0 %v104_v2, %s135_s16  ;;  %25 = vrot.lane.b32.xlu1 %v106_v3, %s136_s17  ;;  %s141_s7 = smov 56   ;;  %s142_s8 = smov 48   ;;  %v113_v11 = vld [vmem:[%s209_s0 + $0x5] sm:$0x1]   ;;  %v114_v12 = vld [vmem:[%s209_s0 + $0x4] sm:$0x1]  }
   0x7   :  { %s143_s13 = smov 40   ;;  %s144_s14 = smov 32   ;;  %v115_v13 = vld [vmem:[%s209_s0 + $0x3] sm:$0x1]   ;;  %v116_v14 = vld [vmem:[%s209_s0 + $0x2] sm:$0x1]  }
   0x8   :  { %s145_s19 = smov 24   ;;  %s146_s20 = smov 16   ;;  %v117_v15 = vld [vmem:[%s209_s0 + $0x1] sm:$0x1]   ;;  %vm27_vm4 = vcmask 851712   ;;  %vm33_vm5 = vcmask 786112  }
   0x9   :  { %s147_s0 = smov 8   ;;  %vm39_vm6 = vcmask 720512   ;;  %vm45_vm7 = vcmask 654912   ;;  %vm51_vm8 = vcmask 589312   ;;  %vm57_vm9 = vcmask 523712  }
   0xa   :  { %31 = vrot.lane.b32.xlu0 %v107_v4, %s137_s24  ;;  %37 = vrot.lane.b32.xlu1 %v108_v5, %s138_s25  ;;  %vm63_vm10 = vcmask 458112   ;;  %vm69_vm11 = vcmask 392512   ;;  %vm75_vm12 = vcmask 326912   ;;  %vm81_vm13 = vcmask 261312  }
   0xb   :  { %vm87_vm14 = vcmask 195712   ;;  %vm93_vm15 = vcmask 130112  }
   0xe   :  { %43 = vrot.lane.b32.xlu0 %v109_v7, %s139_s30  ;;  %49 = vrot.lane.b32.xlu1 %v110_v8, %s140_s2 }
  0x12   :  { %55 = vrot.lane.b32.xlu0 %v111_v9, %s141_s7  ;;  %61 = vrot.lane.b32.xlu1 %v112_v10, %s142_s8 }
  0x16   :  { %67 = vrot.lane.b32.xlu0 %v113_v11, %s143_s13  ;;  %73 = vrot.lane.b32.xlu1 %v114_v12, %s144_s14 }
  0x1a   :  { %79 = vrot.lane.b32.xlu0 %v115_v13, %s145_s19  ;;  %85 = vrot.lane.b32.xlu1 %v116_v14, %s146_s20 }
  0x1e   :  { %91 = vrot.lane.b32.xlu0 %v117_v15, %s147_s0 }
  0x74   :  { %v8_v16 = vpop.permute.xlu0 %7   ;;  %v20_v17 = vpop.permute.xlu1 %19  }
  0x75   :  { %10 = vst.msk [vmem:[#allocation0] sm:$0x1] %vm9_vm1, %v8_v16  }
  0x78   :  { %v14_v18 = vpop.permute.xlu0 %13   ;;  %v26_v19 = vpop.permute.xlu1 %25  }
  0x79   :  { %16 = vst.msk [vmem:[#allocation0] sm:$0x1] %vm15_vm2, %v14_v18  }
  0x7a   :  { %22 = vst.msk [vmem:[#allocation0] sm:$0x1] %vm21_vm3, %v20_v17  }
  0x7b   :  { %28 = vst.msk [vmem:[#allocation0] sm:$0x1] %vm27_vm4, %v26_v19  }
  0x7c   :  { %v32_v20 = vpop.permute.xlu0 %31   ;;  %v38_v21 = vpop.permute.xlu1 %37  }
  0x7d   :  { %34 = vst.msk [vmem:[#allocation0] sm:$0x1] %vm33_vm5, %v32_v20  }
  0x7e   :  { %40 = vst.msk [vmem:[#allocation0] sm:$0x1] %vm39_vm6, %v38_v21  }
  0x80   :  { %v44_v22 = vpop.permute.xlu0 %43   ;;  %v50_v23 = vpop.permute.xlu1 %49  }
  0x81   :  { %46 = vst.msk [vmem:[#allocation0] sm:$0x1] %vm45_vm7, %v44_v22  }
  0x82   :  { %52 = vst.msk [vmem:[#allocation0] sm:$0x1] %vm51_vm8, %v50_v23  }
  0x84   :  { %v56_v24 = vpop.permute.xlu0 %55   ;;  %v62_v25 = vpop.permute.xlu1 %61  }
  0x85   :  { %58 = vst.msk [vmem:[#allocation0] sm:$0x1] %vm57_vm9, %v56_v24  }
  0x86   :  { %64 = vst.msk [vmem:[#allocation0] sm:$0x1] %vm63_vm10, %v62_v25  }
  0x88   :  { %v68_v26 = vpop.permute.xlu0 %67   ;;  %v74_v27 = vpop.permute.xlu1 %73  }
  0x89   :  { %70 = vst.msk [vmem:[#allocation0] sm:$0x1] %vm69_vm11, %v68_v26  }
  0x8a   :  { %76 = vst.msk [vmem:[#allocation0] sm:$0x1] %vm75_vm12, %v74_v27  }
  0x8c   :  { %v80_v28 = vpop.permute.xlu0 %79   ;;  %v86_v29 = vpop.permute.xlu1 %85  }
  0x8d   :  { %82 = vst.msk [vmem:[#allocation0] sm:$0x1] %vm81_vm13, %v80_v28  }
  0x8e   :  { %88 = vst.msk [vmem:[#allocation0] sm:$0x1] %vm87_vm14, %v86_v29  }
  0x90   :  { %v92_v30 = vpop.permute.xlu0 %91  }
  0x91   :  { %94 = vst.msk [vmem:[#allocation0] sm:$0x1] %vm93_vm15, %v92_v30  }
  0x98   :  { %v99_v31 = vld [vmem:[#allocation0] sm:$0x1] }
  0x99   :  { %102 = vst [vmem:[%s210_s1] sm:$0x1] %v99_v31 }

// kernel: basic_block_pallas.1
= control target key start
LH: loop header
LB: loop body
LE: loop exit
PB: predicated region body
PF: predicated region fallthrough
CT: control target
= control target key end

     0   :  { %vm29_vm0 = vsmask.f32 256  ;;  %v31_v6 = vld [vmem:[#allocation2] sm:$0x1]  ;;  %vm28_vm1 = vcmask 516096   ;;  %vm87_vm2 = vcmask 519168   ;;  %s1834_s1 = inlined_call_operand.vmem [shape: bf16[3,64,128], index: 1, kind: input, shape index: {}]   ;;  %s1835_s0 = inlined_call_operand.vmem [shape: bf16[2,16,64], index: 0, kind: input, shape index: {}]   ;;  %s1836_s3 = inlined_call_operand.vmem [shape: bf16[64,128], index: 3, kind: input, shape index: {}]   ;;  %s1837_s2 = inlined_call_operand.vmem [shape: bf16[3,128,128], index: 2, kind: input, shape index: {}]   ;;  %s1838_s4 = inlined_call_operand.vmem [shape: f32[1,128], index: 4, kind: input, shape index: {}]   ;;  %s1839_s5 = inlined_call_operand.vmem [shape: f32[1,128], index: 5, kind: input, shape index: {}]   ;;  %s1840_s6 = inlined_call_operand.vmem [shape: f32[2,16,128], index: 6, kind: output, shape index: {}]  }
   0x1   :  { %v1435_v0 = vld [vmem:[%s1834_s1 + $0x38] sm:$0xff]   ;;  %v1437_v2 = vld [vmem:[%s1834_s1 + $0x30] sm:$0xff]   ;;  %v1439_v4 = vld [vmem:[%s1834_s1 + $0x28] sm:$0xff]   ;;  %vm37_vm4 = vsmask.f32 7938  ;;  %vm208_vm9 = vcmask 523264  }
   0x2   :  { %v1436_v1 = vld [vmem:[%s1834_s1 + $0x18] sm:$0xff]   ;;  %1327 = vmatprep.subr.bf16.mxu0 %v1435_v0  ;;  %v1438_v3 = vld [vmem:[%s1834_s1 + $0x10] sm:$0xff]   ;;  %v1440_v5 = vld [vmem:[%s1834_s1 + $0x8] sm:$0xff]   ;;  %vm45_vm6 = vsmask.f32 4368  ;;  %vm359_vm10 = vcmask 1042432  }
   0x3   :  { %1328 = vmatpush3.bf16.msra.mxu0 %v1435_v0  ;;  %1339 = vmatprep.subr.bf16.mxu1 %v1436_v1  ;;  %v1441_v7 = vld [vmem:[%s1834_s1 + $0x20] sm:$0xff]   ;;  %v1551_v11 = vld [vmem:[%s1835_s0 + $0x8] sm:$0xf]  ;;  %v1556_v12 = vld [vmem:[%s1835_s0 + $0xc] sm:$0xf]  ;;  %vm360_vm13 = vcmask 1046532  }
   0x4   :  { %1340 = vmatpush3.bf16.msra.mxu1 %v1436_v1  ;;  %1329 = vmatprep.subr.bf16.mxu0 %v1437_v2  ;;  %v1442_v8 = vld [vmem:[%s1834_s1] sm:$0xff]   ;;  %vm1560_vm3 = vmand %vm28_vm1, %vm29_vm0  ;;  %v34_v14 = vld [vmem:[#allocation2 + $0xc] sm:$0x1]  ;;  %v65_v26 = vshrl.u32 %v1551_v11, 16  ;;  %v68_v28 = vshll.u32 %v1551_v11, 16  ;;  %v73_v29 = vshrl.u32 %v1556_v12, 16 }
   0x5   :  { %1341 = vmatprep.subr.bf16.mxu1 %v1438_v3  ;;  %v1541_v9 = vld [vmem:[%s1835_s0] sm:$0xf]  ;;  %v1546_v10 = vld [vmem:[%s1835_s0 + $0x4] sm:$0xf]  ;;  %v32_v15 = vsel %vm1560_vm3, 0, %v31_v6  ;;  %v35_v16 = vsel %vm1560_vm3, 0, %v34_v14  ;;  %vm38_vm5 = vmand %vm28_vm1, %vm37_vm4 }
   0x6   :  { %v39_v17 = vld [vmem:[#allocation2 + $0x8] sm:$0x1]  ;;  %v42_v18 = vld [vmem:[#allocation2 + $0x14] sm:$0x1]  ;;  %33 = vst [vmem:[#allocation2] sm:$0x1] %v32_v15  ;;  %vm1585_vm7 = vmor %vm29_vm0, %vm45_vm6 }
   0x7   :  { %1330 = vmatpush3.bf16.msra.mxu0 %v1437_v2  ;;  %36 = vst [vmem:[#allocation2 + $0xc] sm:$0x1] %v35_v16  ;;  %v40_v19 = vsel %vm38_vm5, 0, %v39_v17  ;;  %v43_v20 = vsel %vm38_vm5, 0, %v42_v18  ;;  %v48_v21 = vshrl.u32 %v1541_v9, 16  ;;  %v1574_v22 = vld [vmem:[%s1834_s1 + $0x58] sm:$0xff]   ;;  %vm1591_vm8 = vmand %vm87_vm2, %vm37_vm4 }
   0x8   :  { %1342 = vmatpush3.bf16.msra.mxu1 %v1438_v3  ;;  %1331 = vmatprep.subr.bf16.mxu0 %v1439_v4  ;;  %41 = vst [vmem:[#allocation2 + $0x8] sm:$0x1] %v40_v19  ;;  %44 = vst [vmem:[#allocation2 + $0x14] sm:$0x1] %v43_v20  ;;  %v51_v23 = vshll.u32 %v1541_v9, 16  ;;  %v56_v24 = vshrl.u32 %v1546_v10, 16 }
   0x9   :  { %1343 = vmatprep.subr.bf16.mxu1 %v1440_v5  ;;  %v59_v25 = vshll.u32 %v1546_v10, 16  ;;  %v50_v27 = vrot.slane %v48_v21, 7  ;;  %v76_v30 = vshll.u32 %v1556_v12, 16  ;;  %v67_v32 = vrot.slane %v65_v26, 7  ;;  %vm1624_vm15 = vmor %vm359_vm10, %vm360_vm13  ;;  %v1477_v16 = vld [vmem:[%s1837_s2 + $0x88] sm:$0xff]  }
   0xa   :  { %v58_v31 = vrot.slane %v56_v24, 7  ;;  %v75_v36 = vrot.slane %v73_v29, 7  ;;  %vm118_vm11 = vsmask.f32 3328  ;;  %vm119_vm12 = vsmask.f32 7440 }
   0xb   :  { %1332 = vmatpush3.bf16.msra.mxu0 %v1439_v4  ;;  %v53_v34 = vor.u32 %v51_v23, %v50_v27  ;;  %v54_v35 = vrot.slane %v50_v27, 4  ;;  %v70_v39 = vor.u32 %v68_v28, %v67_v32  ;;  %v71_v40 = vrot.slane %v67_v32, 4  ;;  %vm1617_vm14 = vmor %vm118_vm11, %vm119_vm12 }
   0xc   :  { %1344 = vmatpush3.bf16.msra.mxu1 %v1440_v5  ;;  %1333 = vmatprep.subr.bf16.mxu0 %v1441_v7  ;;  %v61_v37 = vor.u32 %v59_v25, %v58_v31  ;;  %v63_v38 = vrot.slane %v58_v31, 4  ;;  %v78_v42 = vor.u32 %v76_v30, %v75_v36  ;;  %v80_v43 = vrot.slane %v75_v36, 4  ;;  %v1268_v31 = vld [vmem:[%s1839_s5] ss:$0 sm:$0xff] }
   0xd   :  { %1345 = vmatprep.subr.bf16.mxu1 %v1442_v8  ;;  %v89_v45 = vld [vmem:[#allocation2] sm:$0xf]  ;;  %vm489_vm1 = vcmask 1040384  }
   0xe   :  { %v62_v44 = vsel %vm1585_vm7, %v54_v35, %v61_v37  ;;  %v97_v46 = vld [vmem:[#allocation2 + $0xc] sm:$0xf]  ;;  %v79_v47 = vsel %vm1585_vm7, %v71_v40, %v78_v42  ;;  %v90_v48 = vsel %vm1591_vm8, %v53_v34, %v89_v45 }
   0xf   :  { %1334 = vmatpush3.bf16.msra.mxu0 %v1441_v7  ;;  %93 = vst.msk [vmem:[#allocation2 + $0x4] sm:$0xf] %vm87_vm2, %v62_v44  ;;  %v94_v49 = vld [vmem:[#allocation2 + $0x8] sm:$0x1]  ;;  %v98_v50 = vsel %vm1591_vm8, %v70_v39, %v97_v46  ;;  %v101_v51 = vld [vmem:[#allocation2 + $0x14] sm:$0x1] }
  0x10   :  { %1346 = vmatpush3.bf16.msra.mxu1 %v1442_v8  ;;  %1351 = vmatprep.subr.bf16.mxu0 %v1574_v22  ;;  %91 = vst [vmem:[#allocation2] sm:$0xf] %v90_v48  ;;  %v95_v52 = vsel %vm1560_vm3, %v63_v38, %v94_v49  ;;  %100 = vst.msk [vmem:[#allocation2 + $0x10] sm:$0xf] %vm87_vm2, %v79_v47  ;;  %v102_v53 = vsel %vm1560_vm3, %v80_v43, %v101_v51  ;;  %v1446_v47 = vld [vmem:[%s1834_s1 + $0x50] sm:$0xff]   ;;  %vm556_vm3 = vcmask 1043456  }
  0x11   :  { %99 = vst [vmem:[#allocation2 + $0xc] sm:$0xf] %v98_v50  ;;  %96 = vst [vmem:[#allocation2 + $0x8] sm:$0x1] %v95_v52  ;;  %v1447_v50 = vld [vmem:[%s1834_s1 + $0x48] sm:$0xff]  }
  0x12   :  { %103 = vst [vmem:[#allocation2 + $0x14] sm:$0x1] %v102_v53  ;;  %vm1677_vm2 = vmand %vm489_vm1, %vm29_vm0 }
  0x13   :  { %vm1693_vm0 = vmand %vm489_vm1, %vm37_vm4 }
  0x14   :  { %vm1756_vm5 = vmand %vm556_vm3, %vm37_vm4 }
  0x16   :  { %v105_v54 = vld [vmem:[#allocation2 + $0x4] sm:$0xf] }
  0x17   :  { %v104_v55 = vld [vmem:[#allocation2] sm:$0xf]  ;;  %v131_v56 = vshll.u32 %v105_v54, 16  ;;  %v135_v57 = vshrl.u32 %v105_v54, 16  ;;  %v1610_v63 = vld [vmem:[#allocation2 + $0x10] sm:$0xf] }
  0x18   :  { %v106_v58 = vld [vmem:[#allocation2 + $0xc] sm:$0xf]  ;;  %v116_v59 = vld [vmem:[#allocation2 + $0x8] sm:$0x1]  ;;  %v122_v60 = vshrl.u32 %v104_v55, 16  ;;  %v125_v61 = vshll.u32 %v104_v55, 16  ;;  %v1165_v62 = vcombine.low %v104_v55, %v105_v54 }
  0x19   :  { %v133_v0 = vrot.slane %v131_v56, 5  ;;  %v137_v1 = vrot.slane %v135_v57, 4  ;;  %v141_v2 = vshll.u32 %v116_v59, 16  ;;  %v117_v3 = vld [vmem:[#allocation2 + $0x14] sm:$0x1]  ;;  %v146_v6 = vshrl.u32 %v106_v58, 16 }
  0x1a   :  { %v124_v4 = vrot.slane %v122_v60, 4  ;;  %v127_v5 = vrot.slane %v125_v61, 5  ;;  %1347 = vmatprep.mubr.msk.bf16.mxu1 %vm208_vm9, %v1165_v62  ;;  %v149_v7 = vshll.u32 %v106_v58, 16  ;;  %v155_v14 = vshll.u32 %v1610_v63, 16  ;;  %v353_v21 = vld [vmem:[#allocation2] sm:$0xe] }
  0x1b   :  { %v138_v8 = vor.u32 %v137_v1, %v133_v0  ;;  %v143_v13 = vrot.slane %v141_v2, 5  ;;  %v159_v15 = vshrl.u32 %v1610_v63, 16  ;;  %v148_v18 = vrot.slane %v146_v6, 4  ;;  %v354_v51 = vld [vmem:[#allocation2 + $0xc] sm:$0xe]  ;;  %v1448_v55 = vld [vmem:[%s1834_s1 + $0x40] sm:$0xff]  }
  0x1c   :  { %v128_v17 = vor.u32 %v127_v5, %v124_v4  ;;  %v151_v19 = vrot.slane %v149_v7, 5  ;;  %v165_v20 = vshll.u32 %v117_v3, 16  ;;  %v367_v24 = vrot.slane %v116_v59, 5  ;;  %v1450_v59 = vld [vmem:[%s1836_s3 + $0x10] sm:$0xff]   ;;  %v1451_v60 = vld [vmem:[%s1837_s2 + $0x38] sm:$0xff]   ;;  %v1452_v61 = vld [vmem:[%s1836_s3 + $0x8] sm:$0xff]  }
  0x1d   :  { %v139_v23 = vrot.slane %v138_v8, 4  ;;  %v157_v25 = vrot.slane %v155_v14, 5  ;;  %v161_v26 = vrot.slane %v159_v15, 4  ;;  %v1166_v30 = vcombine.low %v106_v58, %v1610_v63  ;;  %v1449_v58 = vld [vmem:[%s1836_s3 + $0x18] sm:$0xff]   ;;  %1363 = vmatprep.subr.bf16.mxu1 %v1451_v60  ;;  %v1453_v62 = vld [vmem:[%s1837_s2 + $0x30] sm:$0xff]   ;;  %v1454_v1 = vld [vmem:[%s1836_s3] sm:$0xff]  }
  0x1e   :  { %v129_v27 = vrot.slane %v128_v17, 4  ;;  %v152_v28 = vor.u32 %v151_v19, %v148_v18  ;;  %v167_v29 = vrot.slane %v165_v20, 5  ;;  %v1173_v35 = vrot.slane %v353_v21, 9  ;;  %v491_v4 = vld [vmem:[#allocation3] sm:$0x1]  ;;  %v1457_v17 = vld [vmem:[%s1837_s2 + $0x20] sm:$0xff]  }
  0x1f   :  { %v144_v32 = vsel %vm1617_vm14, %v139_v23, %v143_v13  ;;  %v162_v34 = vor.u32 %v161_v26, %v157_v25  ;;  %v364_v36 = vrot.slane %v105_v54, 5  ;;  %1348 = vmatmul.mubr.msk.bf16.vlgmr.msra.gmra.mxu1 %vm208_vm9, %v1166_v30  ;;  %v371_v49 = vrot.slane %v1610_v63, 5  ;;  %v501_v7 = vld [vmem:[#allocation3 + $0x14] sm:$0x1]  ;;  %v1456_v13 = vld [vmem:[%s1837_s2 + $0x78] sm:$0xff]   ;;  %v1461_v19 = vld [vmem:[%s1837_s2 + $0x10] sm:$0xff]  }
  0x20   :  { %v134_v37 = vsel %vm1617_vm14, %v129_v27, %v133_v0  ;;  %v153_v38 = vrot.slane %v152_v28, 4  ;;  %v374_v52 = vrot.slane %v117_v3, 5  ;;  %v1174_v53 = vrot.slane %v354_v51, 9  ;;  %1364 = vmatpush3.bf16.msra.mxu1 %v1451_v60  ;;  %v494_v0 = vld [vmem:[#allocation3 + $0xc] sm:$0x1]  ;;  %v1455_v3 = vld [vmem:[%s1837_s2 + $0x28] sm:$0xff]  }
  0x21   :  { %v1157_v39 = vcombine.low %v134_v37, %v144_v32  ;;  %v163_v40 = vrot.slane %v162_v34, 4  ;;  %v365_v41 = vsel %vm1624_vm15, %v1173_v35, %v364_v36  ;;  %v366_v42 = vrot.slane %v364_v36, 4  ;;  %1365 = vmatprep.subr.bf16.mxu1 %v1453_v62  ;;  %v498_v18 = vld [vmem:[#allocation3 + $0x8] sm:$0x1]  ;;  %v1463_v21 = vld [vmem:[%s1837_s2 + $0x8] sm:$0xff]   ;;  %v1464_v23 = vld [vmem:[%s1837_s2 + $0x58] sm:$0xff]  }
  0x22   :  { %v158_v43 = vsel %vm1617_vm14, %v153_v38, %v157_v25  ;;  %v373_v54 = vrot.slane %v371_v49, 4  ;;  %v495_v2 = vsel %vm1677_vm2, 0, %v494_v0  ;;  %v492_v5 = vsel %vm1677_vm2, 0, %v491_v4  ;;  %v1462_v20 = vld [vmem:[%s1837_s2 + $0x60] sm:$0xff]   ;;  %v1466_v25 = vld [vmem:[%s1837_s2 + $0x50] sm:$0xff]   ;;  %v1743_v26 = vld [vmem:[%s1837_s2 + $0xb8] sm:$0xff]  }
  0x23   :  { %1335 = vmatprep.mubr.msk.bf16.mxu0 %vm208_vm9, %v1157_v39  ;;  %v168_v44 = vsel %vm1617_vm14, %v163_v40, %v167_v29  ;;  %v368_v45 = vsel %vm1624_vm15, %v366_v42, %v367_v24  ;;  %496 = vst [vmem:[#allocation3 + $0xc] sm:$0x1] %v495_v2  ;;  %493 = vst [vmem:[#allocation3] sm:$0x1] %v492_v5  ;;  %v1206_v8 = vcombine.low %v1541_v9, %v1546_v10  ;;  %v1458_v10 = vld [vmem:[%s1837_s2 + $0x70] sm:$0xff]   ;;  %v1465_v24 = vld [vmem:[%s1837_s2] sm:$0xff]  }
  0x24   :  { %v1158_v46 = vcombine.low %v158_v43, %v168_v44  ;;  %v1183_v48 = vcombine.low %v365_v41, %v368_v45  ;;  %v375_v56 = vsel %vm1624_vm15, %v373_v54, %v374_v52  ;;  %1366 = vmatpush3.bf16.msra.mxu1 %v1453_v62  ;;  %v502_v14 = vsel %vm1693_vm0, 0, %v501_v7  ;;  %v1470_v27 = vld [vmem:[%s1837_s2 + $0x48] sm:$0xff]   ;;  %v1472_v28 = vld [vmem:[%s1837_s2 + $0x40] sm:$0xff]  }
  0x25   :  { %1367 = vmatprep.subr.bf16.mxu1 %v1455_v3  ;;  %v1207_v15 = vcombine.low %v1551_v11, %v1556_v12  ;;  %503 = vst [vmem:[#allocation3 + $0x14] sm:$0x1] %v502_v14  ;;  %v499_v9 = vsel %vm1693_vm0, 0, %v498_v18  ;;  %v1459_v11 = vld [vmem:[%s1837_s2 + $0x18] sm:$0xff]   ;;  %v1460_v12 = vld [vmem:[%s1837_s2 + $0x68] sm:$0xff]  }
  0x26   :  { %1336 = vmatmul.mubr.msk.bf16.vlgmr.msra.gmra.mxu0 %vm208_vm9, %v1158_v46  ;;  %500 = vst [vmem:[#allocation3 + $0x8] sm:$0x1] %v499_v9  ;;  %v1191_v40 = vld [vmem:[%s1838_s4] ss:$0 sm:$0xff] }
  0x27   :  { %1352 = vmatpush3.bf16.msra.mxu0 %v1574_v22  ;;  %1359 = vmatprep.mubr.msk.bf16.mxu0 %vm208_vm9, %v1183_v48  ;;  %v372_v22 = vsel %vm1624_vm15, %v1174_v53, %v371_v49 }
  0x28   :  { %1353 = vmatprep.subr.bf16.mxu0 %v1446_v47  ;;  %v1184_v57 = vcombine.low %v372_v22, %v375_v56  ;;  %1368 = vmatpush3.bf16.msra.mxu1 %v1455_v3 }
  0x29   :  { %1369 = vmatprep.subr.bf16.mxu1 %v1457_v17 }
  0x2a   :  { %v565_v3 = vld [vmem:[#allocation3 + $0xc] sm:$0xf] }
  0x2b   :  { %1354 = vmatpush3.bf16.msra.mxu0 %v1446_v47 }
  0x2c   :  { %1355 = vmatprep.subr.bf16.mxu0 %v1447_v50  ;;  %1370 = vmatpush3.bf16.msra.mxu1 %v1457_v17 }
  0x2d   :  { %1371 = vmatprep.subr.bf16.mxu1 %v1459_v11 }
  0x2f   :  { %1356 = vmatpush3.bf16.msra.mxu0 %v1447_v50 }
  0x30   :  { %1357 = vmatprep.subr.bf16.mxu0 %v1448_v55  ;;  %1372 = vmatpush3.bf16.msra.mxu1 %v1459_v11 }
  0x31   :  { %1373 = vmatprep.subr.bf16.mxu1 %v1461_v19 }
  0x33   :  { %1358 = vmatpush3.bf16.msra.mxu0 %v1448_v55 }
  0x34   :  { %1383 = vmatprep.subr.bf16.mxu0 %v1449_v58  ;;  %1374 = vmatpush3.bf16.msra.mxu1 %v1461_v19 }
  0x35   :  { %1375 = vmatprep.subr.bf16.mxu1 %v1463_v21 }
  0x36   :  { %1360 = vmatmul.mubr.msk.bf16.vlgmr.msra.gmra.mxu0 %vm208_vm9, %v1184_v57 }
  0x37   :  { %1384 = vmatpush3.bf16.msra.mxu0 %v1449_v58  ;;  %1391 = vmatprep.mubr.msk.bf16.mxu0 %vm208_vm9, %v1206_v8 }
  0x38   :  { %1385 = vmatprep.subr.bf16.mxu0 %v1450_v59  ;;  %1376 = vmatpush3.bf16.msra.mxu1 %v1463_v21 }
  0x39   :  { %1377 = vmatprep.subr.bf16.mxu1 %v1465_v24 }
  0x3b   :  { %1386 = vmatpush3.bf16.msra.mxu0 %v1450_v59 }
  0x3c   :  { %1387 = vmatprep.subr.bf16.mxu0 %v1452_v61  ;;  %1378 = vmatpush3.bf16.msra.mxu1 %v1465_v24 }
  0x3d   :  { %1415 = vmatprep.subr.bf16.mxu1 %v1743_v26 }
  0x3f   :  { %1388 = vmatpush3.bf16.msra.mxu0 %v1452_v61 }
  0x40   :  { %1389 = vmatprep.subr.bf16.mxu0 %v1454_v1 }
  0x43   :  { %1390 = vmatpush3.bf16.msra.mxu0 %v1454_v1 }
  0x44   :  { %1395 = vmatprep.subr.bf16.mxu0 %v1456_v13 }
  0x46   :  { %1392 = vmatmul.mubr.msk.bf16.vlgmr.msra.gmra.mxu0 %vm208_vm9, %v1207_v15 }
  0x47   :  { %1396 = vmatpush3.bf16.msra.mxu0 %v1456_v13  ;;  %v558_v13 = vld [vmem:[#allocation3] sm:$0xf] }
  0x48   :  { %1397 = vmatprep.subr.bf16.mxu0 %v1458_v10 }
  0x4b   :  { %1398 = vmatpush3.bf16.msra.mxu0 %v1458_v10  ;;  %v569_v10 = vld [vmem:[#allocation3 + $0x14] sm:$0x1] }
  0x4c   :  { %1399 = vmatprep.subr.bf16.mxu0 %v1460_v12 }
  0x4f   :  { %1400 = vmatpush3.bf16.msra.mxu0 %v1460_v12 }
  0x50   :  { %1401 = vmatprep.subr.bf16.mxu0 %v1462_v20 }
  0x53   :  { %1402 = vmatpush3.bf16.msra.mxu0 %v1462_v20 }
  0x54   :  { %1403 = vmatprep.subr.bf16.mxu0 %v1464_v23 }
  0x57   :  { %1404 = vmatpush3.bf16.msra.mxu0 %v1464_v23 }
  0x58   :  { %1405 = vmatprep.subr.bf16.mxu0 %v1466_v25 }
  0x5b   :  { %1406 = vmatpush3.bf16.msra.mxu0 %v1466_v25 }
  0x5c   :  { %1407 = vmatprep.subr.bf16.mxu0 %v1470_v27 }
  0x5f   :  { %1408 = vmatpush3.bf16.msra.mxu0 %v1470_v27 }
  0x60   :  { %1409 = vmatprep.subr.bf16.mxu0 %v1472_v28 }
  0x63   :  { %1410 = vmatpush3.bf16.msra.mxu0 %v1472_v28  ;;  %v562_v28 = vld [vmem:[#allocation3 + $0x8] sm:$0x1] }
  0xdf   :  { %v1349_v30 = vpop.f32.mrf.mxu1 }
  0xe1   :  { %v338_v34 = vpop.f32.mrf.mxu1 }
  0xe3   :  { %v1350_v36 = vpop.f32.mrf.mxu1 }
  0xe5   :  { %v341_v43 = vpop.f32.mrf.mxu1 }
  0xe6   :  { %v1337_v29 = vpop.f32.mrf.mxu0 }
  0xe7   :  { %v347_v38 = vadd.f32 %v1349_v30, %v1337_v29 }
  0xe8   :  { %v249_v32 = vpop.f32.mrf.mxu0 }
  0xe9   :  { %v339_v41 = vadd.f32 %v338_v34, %v249_v32 }
  0xea   :  { %v1338_v35 = vpop.f32.mrf.mxu0 }
  0xeb   :  { %v350_v45 = vadd.f32 %v1350_v36, %v1338_v35 }
  0xec   :  { %v252_v37 = vpop.f32.mrf.mxu0 }
  0xed   :  { %v342_v49 = vadd.f32 %v341_v43, %v252_v37 }
  0xf6   :  { %v1361_v39 = vpop.f32.mrf.mxu0 }
  0xf7   :  { %v472_v42 = vadd.f32 %v1361_v39, %v347_v38 }
  0xf8   :  { %v455_v44 = vpop.f32.mrf.mxu0 }
  0xf9   :  { %v483_v46 = vadd.f32 %v1191_v40, %v472_v42  ;;  %v470_v47 = vadd.f32 %v455_v44, %v339_v41 }
  0xfa   :  { %v1362_v48 = vpop.f32.mrf.mxu0 }
  0xfb   :  { %v487_v50 = vmax.f32 %v483_v46, 0.0  ;;  %v481_v51 = vadd.f32 %v1191_v40, %v470_v47  ;;  %v473_v52 = vadd.f32 %v1362_v48, %v350_v45  ;;  %v1471_v48 = vld [vmem:[%s1837_s2 + $0xb0] sm:$0xff]  }
  0xfc   :  { %v458_v53 = vpop.f32.mrf.mxu0 }
  0xfd   :  { %v1271_v54 = vpack.c.bf16 %v487_v50, %v487_v50  ;;  %v485_v55 = vmax.f32 %v481_v51, 0.0  ;;  %v484_v22 = vadd.f32 %v1191_v40, %v473_v52  ;;  %v471_v56 = vadd.f32 %v458_v53, %v342_v49 }
  0xff   :  { %v534_v57 = vshrl.u32 %v1271_v54, 16  ;;  %v1269_v58 = vpack.c.bf16 %v485_v55, %v485_v55  ;;  %v488_v59 = vmax.f32 %v484_v22, 0.0  ;;  %v482_v60 = vadd.f32 %v1191_v40, %v471_v56 }
 0x100   :  { %v537_v62 = vshll.u32 %v1271_v54, 16 }
 0x101   :  { %v536_v61 = vrot.slane %v534_v57, 7  ;;  %v517_v0 = vshrl.u32 %v1269_v58, 16  ;;  %v1272_v1 = vpack.c.bf16 %v488_v59, %v488_v59  ;;  %v486_v4 = vmax.f32 %v482_v60, 0.0 }
 0x102   :  { %v520_v7 = vshll.u32 %v1269_v58, 16 }
 0x103   :  { %v539_v5 = vor.u32 %v537_v62, %v536_v61  ;;  %v519_v6 = vrot.slane %v517_v0, 7  ;;  %v542_v8 = vshrl.u32 %v1272_v1, 16  ;;  %v1270_v14 = vpack.c.bf16 %v486_v4, %v486_v4 }
 0x104   :  { %v545_v9 = vshll.u32 %v1272_v1, 16  ;;  %v540_v12 = vrot.slane %v536_v61, 4 }
 0x105   :  { %v566_v15 = vsel %vm1756_vm5, %v539_v5, %v565_v3  ;;  %v522_v17 = vor.u32 %v520_v7, %v519_v6  ;;  %v544_v18 = vrot.slane %v542_v8, 7  ;;  %v525_v11 = vshrl.u32 %v1270_v14, 16  ;;  %v1473_v7 = vld [vmem:[%s1837_s2 + $0xa8] sm:$0xff]  }
 0x106   :  { %567 = vst [vmem:[#allocation3 + $0xc] sm:$0xf] %v566_v15  ;;  %v528_v24 = vshll.u32 %v1270_v14, 16  ;;  %v523_v29 = vrot.slane %v519_v6, 4 }
 0x107   :  { %v559_v19 = vsel %vm1756_vm5, %v522_v17, %v558_v13  ;;  %v547_v20 = vor.u32 %v545_v9, %v544_v18  ;;  %v549_v21 = vrot.slane %v544_v18, 4  ;;  %v527_v23 = vrot.slane %v525_v11, 7 }
 0x108   :  { %560 = vst [vmem:[#allocation3] sm:$0xf] %v559_v19  ;;  %v1474_v19 = vld [vmem:[%s1837_s2 + $0xa0] sm:$0xff]  }
 0x109   :  { %v548_v25 = vsel %vm1585_vm7, %v540_v12, %v547_v20  ;;  %v570_v27 = vsel %vm1677_vm2, %v549_v21, %v569_v10  ;;  %v530_v30 = vor.u32 %v528_v24, %v527_v23  ;;  %v532_v32 = vrot.slane %v527_v23, 4  ;;  %v1475_v24 = vld [vmem:[%s1837_s2 + $0x98] sm:$0xff]  }
 0x10a   :  { %568 = vst [vmem:[#allocation3 + $0x10] sm:$0xf] %v548_v25  ;;  %571 = vst [vmem:[#allocation3 + $0x14] sm:$0x1] %v570_v27  ;;  %v1476_v25 = vld [vmem:[%s1837_s2 + $0x90] sm:$0xff]  }
 0x10b   :  { %v531_v34 = vsel %vm1585_vm7, %v523_v29, %v530_v30  ;;  %v563_v35 = vsel %vm1677_vm2, %v532_v32, %v562_v28  ;;  %v1478_v28 = vld [vmem:[%s1837_s2 + $0x80] sm:$0xff]  }
 0x10c   :  { %561 = vst [vmem:[#allocation3 + $0x4] sm:$0xf] %v531_v34  ;;  %564 = vst [vmem:[#allocation3 + $0x8] sm:$0x1] %v563_v35 }
 0x10d   :  { %v801_v36 = vld [vmem:[#allocation3 + $0xc] sm:$0xf] }
 0x10e   :  { %v829_v37 = vshrl.u32 %v801_v36, 16  ;;  %v832_v38 = vshll.u32 %v801_v36, 16  ;;  %v979_v30 = vld [vmem:[#allocation3 + $0xc] sm:$0xe] }
 0x10f   :  { %v798_v39 = vld [vmem:[#allocation3] sm:$0xf]  ;;  %v1241_v34 = vrot.slane %v979_v30, 9 }
 0x110   :  { %v978_v40 = vld [vmem:[#allocation3] sm:$0xe]  ;;  %v805_v41 = vshrl.u32 %v798_v39, 16  ;;  %v808_v42 = vshll.u32 %v798_v39, 16  ;;  %v831_v44 = vrot.slane %v829_v37, 4  ;;  %v834_v45 = vrot.slane %v832_v38, 5  ;;  %v1393_v38 = vpop.f32.mrf.mxu0 }
 0x111   :  { %v1772_v43 = vld [vmem:[#allocation3 + $0x10] sm:$0xf]  ;;  %v1240_v49 = vrot.slane %v978_v40, 9  ;;  %v1779_v50 = vld [vmem:[#allocation3 + $0x14] sm:$0x1] }
 0x112   :  { %v807_v46 = vrot.slane %v805_v41, 4  ;;  %v810_v47 = vrot.slane %v808_v42, 5  ;;  %v838_v33 = vshll.u32 %v1772_v43, 16  ;;  %v842_v63 = vshrl.u32 %v1772_v43, 16  ;;  %v1469_v54 = vld [vmem:[#allocation3 + $0xc] sm:$0xff]   ;;  %v783_v39 = vpop.f32.mrf.mxu0 }
 0x113   :  { %v1467_v51 = vld [vmem:[#allocation3] sm:$0xff]   ;;  %v800_v55 = vld [vmem:[#allocation3 + $0x8] sm:$0x1]  ;;  %v835_v60 = vor.u32 %v834_v45, %v831_v44  ;;  %v848_v62 = vshll.u32 %v1779_v50, 16  ;;  %v995_v27 = vrot.slane %v1772_v43, 5  ;;  %v998_v32 = vrot.slane %v1779_v50, 5 }
 0x114   :  { %v799_v52 = vld [vmem:[#allocation3 + $0x4] sm:$0xf]  ;;  %v840_v53 = vrot.slane %v838_v33, 5  ;;  %v811_v56 = vor.u32 %v810_v47, %v807_v46  ;;  %1379 = vmatprep.mubr.bf16.mxu1 %v1467_v51  ;;  %v991_v59 = vrot.slane %v800_v55, 5  ;;  %v844_v61 = vrot.slane %v842_v63, 4  ;;  %v1394_v40 = vpop.f32.mrf.mxu0 }
 0x115   :  { %v988_v22 = vrot.slane %v799_v52, 5  ;;  %v814_v57 = vshll.u32 %v799_v52, 16  ;;  %v818_v58 = vshrl.u32 %v799_v52, 16  ;;  %1380 = vmatmul.mubr.bf16.vlgmr.msra.gmra.mxu1 %v1469_v54  ;;  %v824_v3 = vshll.u32 %v800_v55, 16 }
 0x116   :  { %1416 = vmatpush3.bf16.msra.mxu1 %v1743_v26  ;;  %v845_v4 = vor.u32 %v844_v61, %v840_v53  ;;  %v812_v8 = vrot.slane %v811_v56, 4  ;;  %v836_v15 = vrot.slane %v835_v60, 4  ;;  %v850_v18 = vrot.slane %v848_v62, 5  ;;  %v786_v42 = vpop.f32.mrf.mxu0 }
 0x117   :  { %v990_v0 = vrot.slane %v988_v22, 4  ;;  %v816_v1 = vrot.slane %v814_v57, 5  ;;  %v820_v2 = vrot.slane %v818_v58, 4  ;;  %1417 = vmatprep.subr.bf16.mxu1 %v1471_v48  ;;  %v989_v5 = vsel %vm1624_vm15, %v1240_v49, %v988_v22 }
 0x118   :  { %v846_v17 = vrot.slane %v845_v4, 4  ;;  %v826_v26 = vrot.slane %v824_v3, 5  ;;  %v841_v21 = vsel %vm1617_vm14, %v836_v15, %v840_v53  ;;  %v997_v29 = vrot.slane %v995_v27, 4 }
 0x119   :  { %v992_v6 = vsel %vm1624_vm15, %v990_v0, %v991_v59  ;;  %v821_v13 = vor.u32 %v820_v2, %v816_v1  ;;  %v817_v11 = vsel %vm1617_vm14, %v812_v8, %v816_v1  ;;  %v996_v36 = vsel %vm1624_vm15, %v1241_v34, %v995_v27 }
 0x11a   :  { %v1258_v14 = vcombine.low %v989_v5, %v992_v6  ;;  %1418 = vmatpush3.bf16.msra.mxu1 %v1471_v48  ;;  %v851_v10 = vsel %vm1617_vm14, %v846_v17, %v850_v18  ;;  %v999_v35 = vsel %vm1624_vm15, %v997_v29, %v998_v32 }
 0x11b   :  { %v822_v9 = vrot.slane %v821_v13, 4  ;;  %1419 = vmatprep.subr.bf16.mxu1 %v1473_v7  ;;  %v1231_v23 = vcombine.low %v841_v21, %v851_v10  ;;  %v1259_v37 = vcombine.low %v996_v36, %v999_v35 }
 0x11c   :  { %1431 = vmatprep.mubr.bf16.mxu1 %v1258_v14 }
 0x11d   :  { %v827_v12 = vsel %vm1617_vm14, %v822_v9, %v826_v26 }
 0x11e   :  { %v1230_v20 = vcombine.low %v817_v11, %v827_v12  ;;  %1420 = vmatpush3.bf16.msra.mxu1 %v1473_v7 }
 0x11f   :  { %1421 = vmatprep.subr.bf16.mxu1 %v1474_v19 }
 0x120   :  { %1411 = vmatprep.mubr.bf16.mxu0 %v1230_v20 }
 0x121   :  { %1412 = vmatmul.mubr.bf16.vlgmr.msra.gmra.mxu0 %v1231_v23 }
 0x122   :  { %1422 = vmatpush3.bf16.msra.mxu1 %v1474_v19 }
 0x123   :  { %1423 = vmatprep.subr.bf16.mxu1 %v1475_v24 }
 0x126   :  { %1424 = vmatpush3.bf16.msra.mxu1 %v1475_v24 }
 0x127   :  { %1425 = vmatprep.subr.bf16.mxu1 %v1476_v25 }
 0x12a   :  { %1426 = vmatpush3.bf16.msra.mxu1 %v1476_v25 }
 0x12b   :  { %1427 = vmatprep.subr.bf16.mxu1 %v1477_v16 }
 0x12e   :  { %1428 = vmatpush3.bf16.msra.mxu1 %v1477_v16 }
 0x12f   :  { %1429 = vmatprep.subr.bf16.mxu1 %v1478_v28 }
 0x132   :  { %1430 = vmatpush3.bf16.msra.mxu1 %v1478_v28 }
 0x135   :  { %1432 = vmatmul.mubr.bf16.vlgmr.msra.gmra.mxu1 %v1259_v37 }
 0x1d5   :  { %v1381_v41 = vpop.f32.mrf.mxu1 }
 0x1d6   :  { %v792_v47 = vadd.f32 %v1393_v38, %v1381_v41 }
 0x1d7   :  { %v694_v43 = vpop.f32.mrf.mxu1 }
 0x1d8   :  { %v784_v48 = vadd.f32 %v783_v39, %v694_v43 }
 0x1d9   :  { %v1382_v45 = vpop.f32.mrf.mxu1 }
 0x1da   :  { %v795_v51 = vadd.f32 %v1394_v40, %v1382_v45 }
 0x1db   :  { %v697_v33 = vpop.f32.mrf.mxu1 }
 0x1dc   :  { %v787_v22 = vadd.f32 %v786_v42, %v697_v33 }
 0x1e1   :  { %v1413_v44 = vpop.f32.mrf.mxu0 }
 0x1e2   :  { %v976_v49 = vadd.f32 %v1413_v44, %v792_v47 }
 0x1e3   :  { %v959_v46 = vpop.f32.mrf.mxu0 }
 0x1e4   :  { %v974_v52 = vadd.f32 %v959_v46, %v784_v48 }
 0x1e5   :  { %v1414_v63 = vpop.f32.mrf.mxu0 }
 0x1e6   :  { %v977_v56 = vadd.f32 %v1414_v63, %v795_v51 }
 0x1e7   :  { %v962_v54 = vpop.f32.mrf.mxu0 }
 0x1e8   :  { %v975_v60 = vadd.f32 %v962_v54, %v787_v22 }
 0x1f5   :  { %v1433_v50 = vpop.f32.mrf.mxu1 }
 0x1f6   :  { %v1124_v53 = vadd.f32 %v1433_v50, %v976_v49 }
 0x1f7   :  { %v1107_v55 = vpop.f32.mrf.mxu1 }
 0x1f8   :  { %v1135_v57 = vadd.f32 %v1268_v31, %v1124_v53  ;;  %v1122_v58 = vadd.f32 %v1107_v55, %v974_v52 }
 0x1f9   :  { %v1434_v59 = vpop.f32.mrf.mxu1 }
 0x1fa   :  { %v1139_v61 = vmax.f32 %v1135_v57, 0.0  ;;  %v1133_v62 = vadd.f32 %v1268_v31, %v1122_v58  ;;  %v1125_v0 = vadd.f32 %v1434_v59, %v977_v56 }
 0x1fb   :  { %v1110_v1 = vpop.f32.mrf.mxu1 }
 0x1fc   :  { %1143 = vst [vmem:[%s1840_s6 + $0x10] sm:$0xff] %v1139_v61  ;;  %v1137_v2 = vmax.f32 %v1133_v62, 0.0  ;;  %v1136_v3 = vadd.f32 %v1268_v31, %v1125_v0  ;;  %v1123_v4 = vadd.f32 %v1110_v1, %v975_v60 }
 0x1fe   :  { %1141 = vst [vmem:[%s1840_s6] sm:$0xff] %v1137_v2  ;;  %v1140_v5 = vmax.f32 %v1136_v3, 0.0  ;;  %v1134_v6 = vadd.f32 %v1268_v31, %v1123_v4 }
 0x200   :  { %1144 = vst [vmem:[%s1840_s6 + $0x18] sm:$0xff] %v1140_v5  ;;  %v1138_v7 = vmax.f32 %v1134_v6, 0.0 }
 0x202   :  { %1142 = vst [vmem:[%s1840_s6 + $0x8] sm:$0xff] %v1138_v7 }

</bundles_post_ra>
